<compile_context>
chip_gen: v6e
topology: v6e:2x2x1
jax: 0.10.0
libtpu: 0.0.40
codegen_flags: <defaults>
</compile_context>

<pallas_src>
import functools

import jax
import jax.numpy as jnp
from jax.experimental import pallas as pl
from jax.experimental.pallas import tpu as pltpu


def _round_up(n, m):
    return ((n + m - 1) // m) * m


def _default_max_tile():
    """Per-chip cap on the batch tile (rows fed to the MXU per matmul)."""
    # v5e's MXU consumes 128 rows per pass -> 128-row tiles already saturate
    # its M dimension; v6e/v7x have 256-row MXUs -> 256-row tiles fill them.
    try:
        kind = jax.devices()[0].device_kind.lower()
    except Exception:
        return 256
    if "v5" in kind or "v4" in kind or "v3" in kind:
        return 128
    return 256


def _make_mlp_kernel(n_layers, w_row_offs, dim_x, width, use_bf16):
    """Fused MLP forward over one (tb, dim_x) batch tile.

    w_row_offs: static row offsets of each layer's (zero-padded) weight block
                inside the packed weight buffer.  Layer 0 uses dim_x rows;
                every later layer uses the constant padded `width` rows.
    """
    op_dtype = jnp.bfloat16 if use_bf16 else jnp.float32

    def kernel(x_ref, w_ref, b_ref, out_ref):
        # Layer 0 consumes the raw (tb, dim_x) activations; every later layer
        # works on a constant lane-dense (tb, width) tile (padded cols are 0).
        h = x_ref[...].astype(op_dtype)
        for li in range(n_layers):
            off = w_row_offs[li]
            rows = dim_x if li == 0 else width
            w = w_ref[off:off + rows, :]                   # static, aligned slice
            h = jnp.dot(h, w, preferred_element_type=jnp.float32)   # MXU, f32 acc
            h = h + b_ref[li:li + 1, :]                    # f32 bias add (broadcast)
            if li < n_layers - 1:
                h = jnp.maximum(h, 0.0).astype(op_dtype)   # ReLU, back to MXU dtype
        out_ref[...] = h                                   # lane-dense f32 store

    return kernel


@functools.partial(
    jax.jit,
    static_argnames=("w_row_offs", "dim_x", "dim_y", "width", "n_layers",
                     "use_bf16", "max_tile"))
def _mlp_forward_pallas(x, y, w_packed, b_packed, *, w_row_offs, dim_x, dim_y,
                        width, n_layers, use_bf16, max_tile):
    batch = x.shape[0]

    # One big tile when the batch fits (each grid step is a sequential ~0.35us
    # overhead), capped at the MXU-filling row count so large batches still
    # split into >=2 independent "parallel" tiles (feeds both TCs on v7x).
    tb = min(_round_up(batch, 8), max_tile)
    num_tiles = pl.cdiv(batch, tb)

    kernel = _make_mlp_kernel(n_layers, w_row_offs, dim_x, width, use_bf16)

    preds_pad = pl.pallas_call(
        kernel,
        out_shape=jax.ShapeDtypeStruct((batch, width), jnp.float32),
        grid=(num_tiles,),
        in_specs=[
            pl.BlockSpec((tb, dim_x), lambda i: (i, 0)),
            # Packed params: same block index every step -> stays VMEM-resident
            # (no re-DMA across grid iterations).
            pl.BlockSpec(w_packed.shape, lambda i: (0, 0)),
            pl.BlockSpec(b_packed.shape, lambda i: (0, 0)),
        ],
        out_specs=pl.BlockSpec((tb, width), lambda i: (i, 0)),
        compiler_params=pltpu.CompilerParams(
            # Batch tiles are independent -> shard across v7x's 2 TensorCores.
            dimension_semantics=("parallel",)),
    )(x, w_packed, b_packed)

    # Lane-dense kernel output -> true preds; MSE over the TRUE element count.
    preds = preds_pad[:, :dim_y]
    loss = jnp.mean(jnp.square(preds - y.astype(jnp.float32)))
    return preds, loss


class MLPModelPallas:
    """JAX/Pallas port of MLPModel (forward with loss='mse')."""

    def __init__(self, dim_x, dim_y, dim_hid, key, max_tile=None,
                 use_bf16_matmul=True):
        self.dim_x = int(dim_x)
        self.dim_y = int(dim_y)
        self.dim_hid = list(dim_hid)
        self.use_bf16 = bool(use_bf16_matmul)
        self.max_tile = _default_max_tile() if max_tile is None \
            else max(8, _round_up(int(max_tile), 8))

        dims = [self.dim_x] + self.dim_hid + [self.dim_y]
        self.n_layers = len(dims) - 1
        # Constant lane-dense activation width through all layers.
        self.width = _round_up(max(dims[1:]), 128)

        # --- init params (PyTorch nn.Linear default: U(-1/sqrt(fan_in), +)) ---
        self.weights = []
        self.biases = []
        n_params = 0
        for i in range(self.n_layers):
            key, wk, bk = jax.random.split(key, 3)
            fan_in, fan_out = dims[i], dims[i + 1]
            bound = 1.0 / float(fan_in) ** 0.5
            w = jax.random.uniform(wk, (fan_in, fan_out), jnp.float32, -bound, bound)
            b = jax.random.uniform(bk, (fan_out,), jnp.float32, -bound, bound)
            self.weights.append(w)
            self.biases.append(b)
            n_params += w.size + b.size
        print(f"Number of Parameters: {n_params}")

        # --- pack weights (bf16 when enabled) into one aligned buffer --------
        param_dtype = jnp.bfloat16 if self.use_bf16 else jnp.float32
        w_row_offs = []
        rows = 0
        for i in range(self.n_layers):
            w_row_offs.append(rows)
            rows += _round_up(self.dim_x, 128) if i == 0 else self.width
        w_packed = jnp.zeros((rows, self.width), param_dtype)
        for off, w in zip(w_row_offs, self.weights):
            in_d, out_d = w.shape
            w_packed = w_packed.at[off:off + in_d, :out_d].set(w.astype(param_dtype))
        self.w_packed = w_packed
        self.w_row_offs = tuple(w_row_offs)       # hashable -> static jit arg

        # --- biases stay f32 (one row per layer, zero-padded to `width`) -----
        b_rows = _round_up(self.n_layers, 8)
        b_packed = jnp.zeros((b_rows, self.width), jnp.float32)
        for i, b in enumerate(self.biases):
            b_packed = b_packed.at[i, :b.shape[0]].set(b)
        self.b_packed = b_packed

    def predict_ref(self, x, match_kernel=True):
        """Pure-JAX reference (optionally matching the kernel's bf16 operands)."""
        use_bf16 = self.use_bf16 and match_kernel
        h = x.astype(jnp.float32)
        for i, (w, b) in enumerate(zip(self.weights, self.biases)):
            if use_bf16:
                h = jnp.dot(h.astype(jnp.bfloat16), w.astype(jnp.bfloat16),
                            preferred_element_type=jnp.float32) + b
            else:
                h = jnp.dot(h, w, preferred_element_type=jnp.float32) + b
            if i < self.n_layers - 1:
                h = jnp.maximum(h, 0.0)
        return h

    def forward(self, x, y):
        # mimic PyTorch: preds = predict(x).squeeze(dim=0); y = y.squeeze(dim=0)
        if x.ndim == 3 and x.shape[0] == 1:
            x = jnp.squeeze(x, axis=0)
        if y.ndim == 3 and y.shape[0] == 1:
            y = jnp.squeeze(y, axis=0)
        # TODO(synk): 'bce' loss branch (Sigmoid + BCELoss) not implemented; only 'mse'.
        preds, loss = _mlp_forward_pallas(
            x, y, self.w_packed, self.b_packed,
            w_row_offs=self.w_row_offs, dim_x=self.dim_x, dim_y=self.dim_y,
            width=self.width, n_layers=self.n_layers,
            use_bf16=self.use_bf16, max_tile=self.max_tile)
        return {"ys": preds, "loss": loss}


if __name__ == "__main__":
    key = jax.random.PRNGKey(0)

    dim_x, dim_y, dim_hid = 32, 4, [64, 32]
    batch = 100        # rounds to one 104-row tile -> single grid step

    key, mkey, xkey, ykey = jax.random.split(key, 4)
    model = MLPModelPallas(dim_x, dim_y, dim_hid, mkey)

    # batch.x / batch.y carry a leading dim of size 1 that forward() squeezes
    x = jax.random.normal(xkey, (1, batch, dim_x), jnp.float32)
    y = jax.random.normal(ykey, (1, batch, dim_y), jnp.float32)

    outs = model.forward(x, y)
    preds = jax.block_until_ready(outs["ys"])
    loss = jax.block_until_ready(outs["loss"])

    # --- correctness checks (single-tile path) ------------------------------
    x2, y2 = jnp.squeeze(x, 0), jnp.squeeze(y, 0)
    ref_preds = model.predict_ref(x2)                       # matched bf16 operands
    ref_loss = jnp.mean((ref_preds - y2) ** 2)
    assert preds.shape == (batch, dim_y), "bad preds shape"
    assert jnp.allclose(preds, ref_preds, atol=1e-2, rtol=1e-2), "preds mismatch"
    assert jnp.allclose(loss, ref_loss, atol=1e-2, rtol=1e-2), "loss mismatch"

    # looser sanity check vs. a full-f32 reference (bf16 operands round slightly)
    f32_preds = model.predict_ref(x2, match_kernel=False)
    assert jnp.allclose(preds, f32_preds, atol=5e-2, rtol=5e-2), "f32 semantics drift"

    # --- multi-tile path (grid > 1, tail tile not a multiple of the tile) ---
    big = 520
    key, xk2, yk2 = jax.random.split(key, 3)
    xb = jax.random.normal(xk2, (1, big, dim_x), jnp.float32)
    yb = jax.random.normal(yk2, (1, big, dim_y), jnp.float32)
    outs_b = model.forward(xb, yb)
    preds_b = jax.block_until_ready(outs_b["ys"])
    loss_b = jax.block_until_ready(outs_b["loss"])
    ref_b = model.predict_ref(jnp.squeeze(xb, 0))
    ref_loss_b = jnp.mean((ref_b - jnp.squeeze(yb, 0)) ** 2)
    assert preds_b.shape == (big, dim_y), "bad preds shape (multi-tile)"
    assert jnp.allclose(preds_b, ref_b, atol=1e-2, rtol=1e-2), "preds mismatch (multi-tile)"
    assert jnp.allclose(loss_b, ref_loss_b, atol=1e-2, rtol=1e-2), "loss mismatch (multi-tile)"

    print("KERNEL_OK")
</pallas_src>

<mosaic_0001>
module attributes {stable_mosaic.version = 11 : i64} {
  func.func @kernel(%arg0: i32, %arg1: memref<104x32xf32, #tpu.memory_space<vmem>>, %arg2: memref<384x128xbf16, #tpu.memory_space<vmem>>, %arg3: memref<8x128xf32, #tpu.memory_space<vmem>>, %arg4: memref<104x128xf32, #tpu.memory_space<vmem>>) attributes {dimension_semantics = [#tpu.dimension_semantics<parallel>], iteration_bounds = array<i64: 1>, scalar_prefetch = 0 : i64, scratch_operands = 0 : i64, tpu.core_type = #tpu.core_type<tc>, window_params = [{transform_indices = @transform_0, window_bounds = array<i64: 104, 32>}, {pipeline_mode = #tpu.pipeline_mode<synchronous>, transform_indices = @transform_1, window_bounds = array<i64: 384, 128>}, {pipeline_mode = #tpu.pipeline_mode<synchronous>, transform_indices = @transform_2, window_bounds = array<i64: 8, 128>}, {transform_indices = @transform_3, window_bounds = array<i64: 104, 128>}]} {
    %c0 = arith.constant 0 : index
    %c0_0 = arith.constant 0 : index
    %0 = vector.load %arg1[%c0, %c0_0] : memref<104x32xf32, #tpu.memory_space<vmem>>, vector<104x32xf32>
    %1 = arith.truncf %0 : vector<104x32xf32> to vector<104x32xbf16>
    %c0_1 = arith.constant 0 : index
    %c0_2 = arith.constant 0 : index
    %2 = vector.load %arg2[%c0_1, %c0_2] : memref<384x128xbf16, #tpu.memory_space<vmem>>, vector<32x128xbf16>
    %cst = arith.constant dense<0.000000e+00> : vector<104x128xf32>
    %3 = tpu.matmul %1, %2, %cst {dimension_numbers = #tpu.dot_dimension_numbers<[1], [0], [0], [1], [0, 0, 1, 1], [], []>} : vector<104x32xbf16>, vector<32x128xbf16>, vector<104x128xf32> -> vector<104x128xf32>
    %c0_3 = arith.constant 0 : index
    %c0_4 = arith.constant 0 : index
    %4 = vector.load %arg3[%c0_3, %c0_4] : memref<8x128xf32, #tpu.memory_space<vmem>>, vector<1x128xf32>
    %5 = vector.broadcast %4 : vector<1x128xf32> to vector<104x128xf32>
    %6 = arith.addf %3, %5 : vector<104x128xf32>
    %cst_5 = arith.constant 0.000000e+00 : f32
    %7 = vector.broadcast %cst_5 : f32 to vector<104x128xf32>
    %8 = arith.maximumf %6, %7 : vector<104x128xf32>
    %9 = arith.truncf %8 : vector<104x128xf32> to vector<104x128xbf16>
    %c128 = arith.constant 128 : index
    %c0_6 = arith.constant 0 : index
    %10 = vector.load %arg2[%c128, %c0_6] : memref<384x128xbf16, #tpu.memory_space<vmem>>, vector<128x128xbf16>
    %cst_7 = arith.constant dense<0.000000e+00> : vector<104x128xf32>
    %11 = tpu.matmul %9, %10, %cst_7 {dimension_numbers = #tpu.dot_dimension_numbers<[1], [0], [0], [1], [0, 0, 1, 1], [], []>} : vector<104x128xbf16>, vector<128x128xbf16>, vector<104x128xf32> -> vector<104x128xf32>
    %c1 = arith.constant 1 : index
    %c0_8 = arith.constant 0 : index
    %12 = vector.load %arg3[%c1, %c0_8] : memref<8x128xf32, #tpu.memory_space<vmem>>, vector<1x128xf32>
    %13 = vector.broadcast %12 : vector<1x128xf32> to vector<104x128xf32>
    %14 = arith.addf %11, %13 : vector<104x128xf32>
    %cst_9 = arith.constant 0.000000e+00 : f32
    %15 = vector.broadcast %cst_9 : f32 to vector<104x128xf32>
    %16 = arith.maximumf %14, %15 : vector<104x128xf32>
    %17 = arith.truncf %16 : vector<104x128xf32> to vector<104x128xbf16>
    %c256 = arith.constant 256 : index
    %c0_10 = arith.constant 0 : index
    %18 = vector.load %arg2[%c256, %c0_10] : memref<384x128xbf16, #tpu.memory_space<vmem>>, vector<128x128xbf16>
    %cst_11 = arith.constant dense<0.000000e+00> : vector<104x128xf32>
    %19 = tpu.matmul %17, %18, %cst_11 {dimension_numbers = #tpu.dot_dimension_numbers<[1], [0], [0], [1], [0, 0, 1, 1], [], []>} : vector<104x128xbf16>, vector<128x128xbf16>, vector<104x128xf32> -> vector<104x128xf32>
    %c2 = arith.constant 2 : index
    %c0_12 = arith.constant 0 : index
    %20 = vector.load %arg3[%c2, %c0_12] : memref<8x128xf32, #tpu.memory_space<vmem>>, vector<1x128xf32>
    %21 = vector.broadcast %20 : vector<1x128xf32> to vector<104x128xf32>
    %22 = arith.addf %19, %21 : vector<104x128xf32>
    %c0_13 = arith.constant 0 : index
    %c0_14 = arith.constant 0 : index
    %23 = vector.load %arg4[%c0_13, %c0_14] : memref<104x128xf32, #tpu.memory_space<vmem>>, vector<104x128xf32>
    tpu.vector_store %arg4[%c0_13, %c0_14], %22 {strides = array<i32>} : memref<104x128xf32, #tpu.memory_space<vmem>>, vector<104x128xf32>,
    return
  }
  func.func @transform_0(%arg0: i32) -> (i32, i32) {
    %c0_i32 = arith.constant 0 : i32
    %c0_i32_0 = arith.constant 0 : i32
    return %arg0, %c0_i32 : i32, i32
  }
  func.func @transform_1(%arg0: i32) -> (i32, i32) {
    %c0_i32 = arith.constant 0 : i32
    %c0_i32_0 = arith.constant 0 : i32
    %c0_i32_1 = arith.constant 0 : i32
    return %c0_i32, %c0_i32_0 : i32, i32
  }
  func.func @transform_2(%arg0: i32) -> (i32, i32) {
    %c0_i32 = arith.constant 0 : i32
    %c0_i32_0 = arith.constant 0 : i32
    %c0_i32_1 = arith.constant 0 : i32
    return %c0_i32, %c0_i32_0 : i32, i32
  }
  func.func @transform_3(%arg0: i32) -> (i32, i32) {
    %c0_i32 = arith.constant 0 : i32
    %c0_i32_0 = arith.constant 0 : i32
    return %arg0, %c0_i32 : i32, i32
  }
}

</mosaic_0001>

<bundles_post_ra>
// kernel: _mlp_forward_pallas.1
= control target key start
LH: loop header
LB: loop body
LE: loop exit
PB: predicated region body
PF: predicated region fallthrough
CT: control target
= control target key end

     0   :  { %8 = vsyncpa [#allocation3], 0  ;;  %s788_s12 = smov [#allocation2]   ;;  %s1002_s0 = inlined_call_operand.vmem [shape: f32[100,32], index: 0, kind: input, shape index: {}]   ;;  %s1003_s1 = inlined_call_operand.hbm [shape: bf16[384,128], index: 1, kind: input, shape index: {}]   ;;  %s1004_s2 = inlined_call_operand.vmem [shape: f32[8,128], index: 2, kind: input, shape index: {}]   ;;  %s1005_s3 = inlined_call_operand.vmem [shape: f32[100,128], index: 3, kind: output, shape index: {}]  }
   0x1   :  { %s16_s13 = sshll.u32 %s788_s12, 4  ;;  %s17_s13 = int_to_ptr.vmem [resolvable:$true] %s16_s13 }
   0x2   :  { %s774_s14 = scalar_lea.vmem %s17_s13, 3072  ;;  %p779_p1 = scmp.lt.s32.totalorder %s17_s13, %s17_s13 }
   0x3   :  { %p775_p0 = scmp.ne.s32.totalorder %s17_s13, %s774_s14  ;;  %p780_p2 = scmp.lt.s32.totalorder %s774_s14, %s774_s14 }
   0x5   :  { %p781_p3 = por %p780_p2, %p779_p1 }
   0x7   :  { %p782_p4 = pnand %p781_p3, %p775_p0 }
   0x9   :  { %785 = shalt.err (!%p782_p4)
}
   0xa   :  { %s789_s15 = smov 64   ;;  %s790_s16 = smov 4  }
   0xb   :  { %22 = dma.hbm_to_vmem [thread:$0]  %s1003_s1, 3072, %s17_s13, [#allocation3], %s789_s15, %s789_s15, %s790_s16  }
   0xc   :  { %786 = dma.done.wait [#allocation3], 3072  }
   0xd   :  { %787 = vsyncadd [#allocation3], 4294964224  ;;  %v791_v0 = vmov 0.0   ;;  %vm792_vm0 = vmmov 0   ;;  %v748_v1 = vld [vmem:[#allocation2 + $0x8] sm:$0xff]   ;;  %v749_v2 = vld [vmem:[#allocation2] sm:$0xff]  }
   0xe   :  { %619 = vmatprep.subr.bf16.mxu0 %v791_v0  ;;  %623 = vmatprep.mubr.msk.bf16.mxu0 %vm792_vm0, %v791_v0  ;;  %v29_v3 = vld [vmem:[%s1002_s0] sm:$0xff]  ;;  %v30_v4 = vld [vmem:[%s1002_s0 + $0x8] sm:$0xff]  ;;  %vm70_vm1 = vcmask 261120   ;;  %v750_v9 = vld [vmem:[#allocation2 + $0x78] sm:$0xff]  }
   0xf   :  { %739 = vmatprep.subr.bf16.mxu1 %v791_v0  ;;  %639 = vmatprep.mubr.msk.bf16.mxu1 %vm792_vm0, %v791_v0  ;;  %v37_v5 = vld [vmem:[%s1002_s0 + $0x40] sm:$0xff]  ;;  %v42_v6 = vpack.c.bf16 %v30_v4, %v29_v3  ;;  %v38_v7 = vld [vmem:[%s1002_s0 + $0x48] sm:$0xff]  ;;  %v31_v10 = vld [vmem:[%s1002_s0 + $0x10] sm:$0xff] }
  0x10   :  { %620 = vmatpush3.bf16.msra.mxu0 %v748_v1  ;;  %741 = vmatpush3.bf16.msra.mxu1 %v748_v1  ;;  %v46_v8 = vpack.c.bf16 %v38_v7, %v37_v5  ;;  %v32_v11 = vld [vmem:[%s1002_s0 + $0x18] sm:$0xff]  ;;  %v39_v12 = vld [vmem:[%s1002_s0 + $0x50] sm:$0xff]  ;;  %v752_v17 = vld [vmem:[#allocation2 + $0x68] sm:$0xff]  }
  0x11   :  { %621 = vmatprep.subr.bf16.mxu0 %v791_v0  ;;  %740 = vmatprep.subr.bf16.mxu1 %v791_v0  ;;  %v40_v13 = vld [vmem:[%s1002_s0 + $0x58] sm:$0xff]  ;;  %v751_v14 = vld [vmem:[#allocation2 + $0x70] sm:$0xff]   ;;  %v43_v15 = vpack.c.bf16 %v32_v11, %v31_v10  ;;  %v33_v18 = vld [vmem:[%s1002_s0 + $0x20] sm:$0xff] }
  0x12   :  { %v47_v16 = vpack.c.bf16 %v40_v13, %v39_v12  ;;  %v34_v19 = vld [vmem:[%s1002_s0 + $0x28] sm:$0xff]  ;;  %v41_v20 = vld [vmem:[%s1002_s0 + $0x60] sm:$0xff]  ;;  %v754_v24 = vld [vmem:[#allocation2 + $0x58] sm:$0xff]  }
  0x13   :  { %v753_v21 = vld [vmem:[#allocation2 + $0x60] sm:$0xff]   ;;  %v44_v22 = vpack.c.bf16 %v34_v19, %v33_v18  ;;  %v48_v23 = vpack.c.bf16 %v41_v20, %v41_v20  ;;  %v35_v25 = vld [vmem:[%s1002_s0 + $0x30] sm:$0xff]  ;;  %v36_v26 = vld [vmem:[%s1002_s0 + $0x38] sm:$0xff] }
  0x14   :  { %622 = vmatpush3.bf16.msra.mxu0 %v749_v2  ;;  %742 = vmatpush3.bf16.msra.mxu1 %v749_v2  ;;  %v45_v27 = vpack.c.bf16 %v36_v26, %v35_v25  ;;  %v755_v28 = vld [vmem:[#allocation2 + $0x50] sm:$0xff]   ;;  %v756_v29 = vld [vmem:[#allocation2 + $0x48] sm:$0xff]   ;;  %v757_v30 = vld [vmem:[#allocation2 + $0x40] sm:$0xff]  }
  0x15   :  { %651 = vmatprep.subr.bf16.mxu1 %v791_v0  ;;  %695 = vmatprep.subr.bf16.mxu0 %v791_v0  ;;  %v758_v31 = vld [vmem:[#allocation2 + $0xb8] sm:$0xff]   ;;  %v759_v32 = vld [vmem:[#allocation2 + $0xb0] sm:$0xff]   ;;  %v760_v33 = vld [vmem:[#allocation2 + $0xa8] sm:$0xff]  }
  0x16   :  { %v761_v34 = vld [vmem:[#allocation2 + $0xa0] sm:$0xff]   ;;  %v762_v35 = vld [vmem:[#allocation2 + $0x98] sm:$0xff]   ;;  %v763_v36 = vld [vmem:[#allocation2 + $0x90] sm:$0xff]  }
  0x17   :  { %624 = vmatmul.mubr.msk.bf16.vlgmr.msra.gmra.mxu0 %vm70_vm1, %v42_v6  ;;  %640 = vmatmul.mubr.msk.bf16.vlgmr.msra.gmra.mxu1 %vm70_vm1, %v46_v8  ;;  %v902_v37 = vld [vmem:[%s1004_s2] ss:$0 sm:$0xff] }
  0x18   :  { %627 = vmatprep.mubr.msk.bf16.mxu0 %vm792_vm0, %v791_v0  ;;  %643 = vmatprep.mubr.msk.bf16.mxu1 %vm792_vm0, %v791_v0 }
  0x19   :  { %652 = vmatpush3.bf16.msra.mxu1 %v750_v9  ;;  %696 = vmatpush3.bf16.msra.mxu0 %v758_v31 }
  0x1a   :  { %653 = vmatprep.subr.bf16.mxu1 %v791_v0  ;;  %697 = vmatprep.subr.bf16.mxu0 %v791_v0 }
  0x1d   :  { %654 = vmatpush3.bf16.msra.mxu1 %v751_v14  ;;  %698 = vmatpush3.bf16.msra.mxu0 %v759_v32 }
  0x1e   :  { %655 = vmatprep.subr.bf16.mxu1 %v791_v0  ;;  %699 = vmatprep.subr.bf16.mxu0 %v791_v0 }
  0x1f   :  { %628 = vmatmul.mubr.msk.bf16.gmra.mxu0 %vm70_vm1, %v43_v15  ;;  %644 = vmatmul.mubr.msk.bf16.gmra.mxu1 %vm70_vm1, %v47_v16 }
  0x20   :  { %631 = vmatprep.mubr.msk.bf16.mxu0 %vm792_vm0, %v791_v0  ;;  %647 = vmatprep.mubr.msk.bf16.mxu1 %vm792_vm0, %v791_v0 }
  0x21   :  { %656 = vmatpush3.bf16.msra.mxu1 %v752_v17  ;;  %700 = vmatpush3.bf16.msra.mxu0 %v760_v33 }
  0x22   :  { %657 = vmatprep.subr.bf16.mxu1 %v791_v0  ;;  %701 = vmatprep.subr.bf16.mxu0 %v791_v0 }
  0x25   :  { %658 = vmatpush3.bf16.msra.mxu1 %v753_v21  ;;  %702 = vmatpush3.bf16.msra.mxu0 %v761_v34 }
  0x26   :  { %659 = vmatprep.subr.bf16.mxu1 %v791_v0  ;;  %703 = vmatprep.subr.bf16.mxu0 %v791_v0 }
  0x27   :  { %632 = vmatmul.mubr.msk.bf16.gmra.mxu0 %vm70_vm1, %v44_v22  ;;  %648 = vmatmul.mubr.msk.bf16.gmra.mxu1 %vm70_vm1, %v48_v23 }
  0x28   :  { %635 = vmatprep.mubr.msk.bf16.mxu0 %vm792_vm0, %v791_v0  ;;  %667 = vmatprep.mubr.msk.bf16.mxu1 %vm792_vm0, %v791_v0 }
  0x29   :  { %660 = vmatpush3.bf16.msra.mxu1 %v754_v24  ;;  %704 = vmatpush3.bf16.msra.mxu0 %v762_v35 }
  0x2a   :  { %661 = vmatprep.subr.bf16.mxu1 %v791_v0  ;;  %705 = vmatprep.subr.bf16.mxu0 %v791_v0 }
  0x2d   :  { %662 = vmatpush3.bf16.msra.mxu1 %v755_v28  ;;  %706 = vmatpush3.bf16.msra.mxu0 %v763_v36  ;;  %v764_v36 = vld [vmem:[#allocation2 + $0x88] sm:$0xff]  }
  0x2e   :  { %663 = vmatprep.subr.bf16.mxu1 %v791_v0  ;;  %707 = vmatprep.subr.bf16.mxu0 %v791_v0 }
  0x2f   :  { %636 = vmatmul.mubr.msk.bf16.gmra.mxu0 %vm70_vm1, %v45_v27 }
  0x30   :  { %711 = vmatprep.mubr.msk.bf16.mxu0 %vm792_vm0, %v791_v0 }
  0x31   :  { %664 = vmatpush3.bf16.msra.mxu1 %v756_v29  ;;  %708 = vmatpush3.bf16.msra.mxu0 %v764_v36 }
  0x32   :  { %665 = vmatprep.subr.bf16.mxu1 %v791_v0  ;;  %709 = vmatprep.subr.bf16.mxu0 %v791_v0 }
  0x35   :  { %666 = vmatpush3.bf16.msra.mxu1 %v757_v30 }
  0xd7   :  { %v126_v38 = vpop.f32.mrf.mxu0  ;;  %v158_v39 = vpop.f32.mrf.mxu1 }
  0xd8   :  { %v127_v42 = vadd.f32 %v902_v37, %v126_v38  ;;  %v159_v22 = vadd.f32 %v902_v37, %v158_v39  ;;  %v765_v38 = vld [vmem:[#allocation2 + $0x80] sm:$0xff]  }
  0xd9   :  { %v625_v40 = vpop.f32.mrf.mxu0  ;;  %v641_v41 = vpop.f32.mrf.mxu1  ;;  %710 = vmatpush3.bf16.msra.mxu0 %v765_v38  ;;  %v933_v39 = vld [vmem:[%s1004_s2 + $0x1] ss:$0 sm:$0xff]  ;;  %v571_v38 = vld [vmem:[%s1004_s2 + $0x2] ss:$0 sm:$0xff] }
  0xda   :  { %v180_v48 = vmax.f32 %v127_v42, 0.0  ;;  %v188_v25 = vmax.f32 %v159_v22, 0.0 }
  0xdb   :  { %v129_v43 = vpop.f32.mrf.mxu0  ;;  %v161_v44 = vpop.f32.mrf.mxu1 }
  0xdc   :  { %v130_v45 = vadd.f32 %v902_v37, %v129_v43  ;;  %v162_v24 = vadd.f32 %v902_v37, %v161_v44 }
  0xdd   :  { %v626_v46 = vpop.f32.mrf.mxu0  ;;  %v642_v47 = vpop.f32.mrf.mxu1 }
  0xde   :  { %v181_v49 = vmax.f32 %v130_v45, 0.0  ;;  %v189_v26 = vmax.f32 %v162_v24, 0.0 }
  0xdf   :  { %v134_v50 = vpop.f32.mrf.mxu0  ;;  %v166_v51 = vpop.f32.mrf.mxu1 }
  0xe0   :  { %v193_v52 = vpack.c.bf16 %v181_v49, %v180_v48  ;;  %v135_v55 = vadd.f32 %v902_v37, %v134_v50  ;;  %v197_v27 = vpack.c.bf16 %v189_v26, %v188_v25  ;;  %v167_v28 = vadd.f32 %v902_v37, %v166_v51 }
  0xe1   :  { %v629_v53 = vpop.f32.mrf.mxu0  ;;  %v645_v54 = vpop.f32.mrf.mxu1 }
  0xe2   :  { %668 = vmatmul.mubr.bf16.vlgmr.msra.gmra.mxu1 %v193_v52  ;;  %v182_v61 = vmax.f32 %v135_v55, 0.0  ;;  %v190_v30 = vmax.f32 %v167_v28, 0.0 }
  0xe3   :  { %v137_v56 = vpop.f32.mrf.mxu0  ;;  %671 = vmatprep.mubr.msk.bf16.mxu1 %vm792_vm0, %v791_v0  ;;  %v169_v57 = vpop.f32.mrf.mxu1 }
  0xe4   :  { %v138_v58 = vadd.f32 %v902_v37, %v137_v56  ;;  %v170_v29 = vadd.f32 %v902_v37, %v169_v57 }
  0xe5   :  { %v630_v59 = vpop.f32.mrf.mxu0  ;;  %v646_v60 = vpop.f32.mrf.mxu1 }
  0xe6   :  { %v183_v62 = vmax.f32 %v138_v58, 0.0  ;;  %v191_v31 = vmax.f32 %v170_v29, 0.0 }
  0xe7   :  { %v142_v63 = vpop.f32.mrf.mxu0  ;;  %v174_v1 = vpop.f32.mrf.mxu1 }
  0xe8   :  { %v194_v2 = vpack.c.bf16 %v183_v62, %v182_v61  ;;  %v143_v5 = vadd.f32 %v902_v37, %v142_v63  ;;  %v175_v32 = vadd.f32 %v902_v37, %v174_v1  ;;  %v198_v33 = vpack.c.bf16 %v191_v31, %v190_v30 }
  0xe9   :  { %v633_v3 = vpop.f32.mrf.mxu0  ;;  %v649_v4 = vpop.f32.mrf.mxu1 }
  0xea   :  { %672 = vmatmul.mubr.bf16.gmra.mxu1 %v194_v2  ;;  %v184_v11 = vmax.f32 %v143_v5, 0.0  ;;  %v192_v34 = vmax.f32 %v175_v32, 0.0 }
  0xeb   :  { %v145_v6 = vpop.f32.mrf.mxu0  ;;  %675 = vmatprep.mubr.msk.bf16.mxu1 %vm792_vm0, %v791_v0  ;;  %v177_v7 = vpop.f32.mrf.mxu1 }
  0xec   :  { %v146_v8 = vadd.f32 %v902_v37, %v145_v6  ;;  %v199_v35 = vpack.c.bf16 %v192_v34, %v192_v34 }
  0xed   :  { %v634_v9 = vpop.f32.mrf.mxu0  ;;  %v650_v10 = vpop.f32.mrf.mxu1 }
  0xee   :  { %v185_v12 = vmax.f32 %v146_v8, 0.0 }
  0xef   :  { %v150_v13 = vpop.f32.mrf.mxu0 }
  0xf0   :  { %v195_v14 = vpack.c.bf16 %v185_v12, %v184_v11  ;;  %v151_v16 = vadd.f32 %v902_v37, %v150_v13 }
  0xf1   :  { %v637_v15 = vpop.f32.mrf.mxu0 }
  0xf2   :  { %676 = vmatmul.mubr.bf16.gmra.mxu1 %v195_v14  ;;  %v186_v20 = vmax.f32 %v151_v16, 0.0 }
  0xf3   :  { %v153_v17 = vpop.f32.mrf.mxu0  ;;  %679 = vmatprep.mubr.msk.bf16.mxu1 %vm792_vm0, %v791_v0 }
  0xf4   :  { %v154_v18 = vadd.f32 %v902_v37, %v153_v17 }
  0xf5   :  { %v638_v19 = vpop.f32.mrf.mxu0 }
  0xf6   :  { %v187_v21 = vmax.f32 %v154_v18, 0.0 }
  0xf8   :  { %v196_v23 = vpack.c.bf16 %v187_v21, %v186_v20 }
  0xfa   :  { %680 = vmatmul.mubr.bf16.gmra.mxu1 %v196_v23 }
  0xfb   :  { %683 = vmatprep.mubr.msk.bf16.mxu1 %vm792_vm0, %v791_v0 }
 0x102   :  { %684 = vmatmul.mubr.bf16.gmra.mxu1 %v197_v27 }
 0x103   :  { %687 = vmatprep.mubr.msk.bf16.mxu1 %vm792_vm0, %v791_v0 }
 0x10a   :  { %688 = vmatmul.mubr.bf16.gmra.mxu1 %v198_v33 }
 0x10b   :  { %691 = vmatprep.mubr.msk.bf16.mxu1 %vm792_vm0, %v791_v0 }
 0x112   :  { %692 = vmatmul.mubr.bf16.gmra.mxu1 %v199_v35 }
 0x1a2   :  { %v303_v37 = vpop.f32.mrf.mxu1 }
 0x1a3   :  { %v304_v41 = vadd.f32 %v933_v39, %v303_v37 }
 0x1a4   :  { %v669_v40 = vpop.f32.mrf.mxu1 }
 0x1a5   :  { %v357_v45 = vmax.f32 %v304_v41, 0.0 }
 0x1a6   :  { %v306_v42 = vpop.f32.mrf.mxu1 }
 0x1a7   :  { %v307_v43 = vadd.f32 %v933_v39, %v306_v42 }
 0x1a8   :  { %v670_v44 = vpop.f32.mrf.mxu1 }
 0x1a9   :  { %v358_v46 = vmax.f32 %v307_v43, 0.0 }
 0x1aa   :  { %v311_v47 = vpop.f32.mrf.mxu1 }
 0x1ab   :  { %v370_v48 = vpack.c.bf16 %v358_v46, %v357_v45  ;;  %v312_v50 = vadd.f32 %v933_v39, %v311_v47 }
 0x1ac   :  { %v673_v49 = vpop.f32.mrf.mxu1 }
 0x1ad   :  { %712 = vmatmul.mubr.bf16.vlgmr.msra.gmra.mxu0 %v370_v48  ;;  %v359_v54 = vmax.f32 %v312_v50, 0.0 }
 0x1ae   :  { %v314_v51 = vpop.f32.mrf.mxu1  ;;  %715 = vmatprep.mubr.msk.bf16.mxu0 %vm792_vm0, %v791_v0 }
 0x1af   :  { %v315_v52 = vadd.f32 %v933_v39, %v314_v51 }
 0x1b0   :  { %v674_v53 = vpop.f32.mrf.mxu1 }
 0x1b1   :  { %v360_v55 = vmax.f32 %v315_v52, 0.0 }
 0x1b2   :  { %v319_v56 = vpop.f32.mrf.mxu1 }
 0x1b3   :  { %v371_v57 = vpack.c.bf16 %v360_v55, %v359_v54  ;;  %v320_v59 = vadd.f32 %v933_v39, %v319_v56 }
 0x1b4   :  { %v677_v58 = vpop.f32.mrf.mxu1 }
 0x1b5   :  { %716 = vmatmul.mubr.bf16.gmra.mxu0 %v371_v57  ;;  %v361_v63 = vmax.f32 %v320_v59, 0.0 }
 0x1b6   :  { %v322_v60 = vpop.f32.mrf.mxu1  ;;  %719 = vmatprep.mubr.msk.bf16.mxu0 %vm792_vm0, %v791_v0 }
 0x1b7   :  { %v323_v61 = vadd.f32 %v933_v39, %v322_v60 }
 0x1b8   :  { %v678_v62 = vpop.f32.mrf.mxu1 }
 0x1b9   :  { %v362_v1 = vmax.f32 %v323_v61, 0.0 }
 0x1ba   :  { %v327_v2 = vpop.f32.mrf.mxu1 }
 0x1bb   :  { %v372_v3 = vpack.c.bf16 %v362_v1, %v361_v63  ;;  %v328_v5 = vadd.f32 %v933_v39, %v327_v2 }
 0x1bc   :  { %v681_v4 = vpop.f32.mrf.mxu1 }
 0x1bd   :  { %720 = vmatmul.mubr.bf16.gmra.mxu0 %v372_v3  ;;  %v363_v9 = vmax.f32 %v328_v5, 0.0 }
 0x1be   :  { %v330_v6 = vpop.f32.mrf.mxu1  ;;  %723 = vmatprep.mubr.msk.bf16.mxu0 %vm792_vm0, %v791_v0 }
 0x1bf   :  { %v331_v7 = vadd.f32 %v933_v39, %v330_v6 }
 0x1c0   :  { %v682_v8 = vpop.f32.mrf.mxu1 }
 0x1c1   :  { %v364_v10 = vmax.f32 %v331_v7, 0.0 }
 0x1c2   :  { %v335_v11 = vpop.f32.mrf.mxu1 }
 0x1c3   :  { %v373_v12 = vpack.c.bf16 %v364_v10, %v363_v9  ;;  %v336_v14 = vadd.f32 %v933_v39, %v335_v11 }
 0x1c4   :  { %v685_v13 = vpop.f32.mrf.mxu1 }
 0x1c5   :  { %724 = vmatmul.mubr.bf16.gmra.mxu0 %v373_v12  ;;  %v365_v18 = vmax.f32 %v336_v14, 0.0 }
 0x1c6   :  { %v338_v15 = vpop.f32.mrf.mxu1  ;;  %727 = vmatprep.mubr.msk.bf16.mxu0 %vm792_vm0, %v791_v0 }
 0x1c7   :  { %v339_v16 = vadd.f32 %v933_v39, %v338_v15 }
 0x1c8   :  { %v686_v17 = vpop.f32.mrf.mxu1 }
 0x1c9   :  { %v366_v19 = vmax.f32 %v339_v16, 0.0 }
 0x1ca   :  { %v343_v20 = vpop.f32.mrf.mxu1 }
 0x1cb   :  { %v374_v21 = vpack.c.bf16 %v366_v19, %v365_v18  ;;  %v344_v23 = vadd.f32 %v933_v39, %v343_v20 }
 0x1cc   :  { %v689_v22 = vpop.f32.mrf.mxu1 }
 0x1cd   :  { %728 = vmatmul.mubr.bf16.gmra.mxu0 %v374_v21  ;;  %v367_v27 = vmax.f32 %v344_v23, 0.0 }
 0x1ce   :  { %v346_v24 = vpop.f32.mrf.mxu1  ;;  %731 = vmatprep.mubr.msk.bf16.mxu0 %vm792_vm0, %v791_v0 }
 0x1cf   :  { %v347_v25 = vadd.f32 %v933_v39, %v346_v24 }
 0x1d0   :  { %v690_v26 = vpop.f32.mrf.mxu1 }
 0x1d1   :  { %v368_v28 = vmax.f32 %v347_v25, 0.0 }
 0x1d2   :  { %v351_v29 = vpop.f32.mrf.mxu1 }
 0x1d3   :  { %v375_v30 = vpack.c.bf16 %v368_v28, %v367_v27  ;;  %v352_v31 = vadd.f32 %v933_v39, %v351_v29 }
 0x1d4   :  { %v693_v32 = vpop.f32.mrf.mxu1 }
 0x1d5   :  { %v369_v33 = vmax.f32 %v352_v31, 0.0  ;;  %732 = vmatmul.mubr.bf16.gmra.mxu0 %v375_v30 }
 0x1d6   :  { %v354_v34 = vpop.f32.mrf.mxu1  ;;  %735 = vmatprep.mubr.msk.bf16.mxu0 %vm792_vm0, %v791_v0 }
 0x1d7   :  { %v376_v36 = vpack.c.bf16 %v369_v33, %v369_v33 }
 0x1d8   :  { %v694_v35 = vpop.f32.mrf.mxu1 }
 0x1dd   :  { %736 = vmatmul.mubr.bf16.gmra.mxu0 %v376_v36 }
 0x26d   :  { %v480_v37 = vpop.f32.mrf.mxu0 }
 0x26e   :  { %v481_v40 = vadd.f32 %v571_v38, %v480_v37 }
 0x26f   :  { %v713_v41 = vpop.f32.mrf.mxu0 }
 0x270   :  { %534 = vst [vmem:[%s1005_s3] sm:$0xff] %v481_v40 }
 0x271   :  { %v483_v39 = vpop.f32.mrf.mxu0 }
 0x272   :  { %v484_v42 = vadd.f32 %v571_v38, %v483_v39 }
 0x273   :  { %v714_v43 = vpop.f32.mrf.mxu0 }
 0x274   :  { %535 = vst [vmem:[%s1005_s3 + $0x8] sm:$0xff] %v484_v42 }
 0x275   :  { %v488_v0 = vpop.f32.mrf.mxu0 }
 0x276   :  { %v489_v44 = vadd.f32 %v571_v38, %v488_v0 }
 0x277   :  { %v717_v45 = vpop.f32.mrf.mxu0 }
 0x278   :  { %536 = vst [vmem:[%s1005_s3 + $0x10] sm:$0xff] %v489_v44 }
 0x279   :  { %v491_v46 = vpop.f32.mrf.mxu0 }
 0x27a   :  { %v492_v47 = vadd.f32 %v571_v38, %v491_v46 }
 0x27b   :  { %v718_v48 = vpop.f32.mrf.mxu0 }
 0x27c   :  { %537 = vst [vmem:[%s1005_s3 + $0x18] sm:$0xff] %v492_v47 }
 0x27d   :  { %v496_v49 = vpop.f32.mrf.mxu0 }
 0x27e   :  { %v497_v50 = vadd.f32 %v571_v38, %v496_v49 }
 0x27f   :  { %v721_v51 = vpop.f32.mrf.mxu0 }
 0x280   :  { %538 = vst [vmem:[%s1005_s3 + $0x20] sm:$0xff] %v497_v50 }
 0x281   :  { %v499_v52 = vpop.f32.mrf.mxu0 }
 0x282   :  { %v500_v53 = vadd.f32 %v571_v38, %v499_v52 }
 0x283   :  { %v722_v54 = vpop.f32.mrf.mxu0 }
 0x284   :  { %539 = vst [vmem:[%s1005_s3 + $0x28] sm:$0xff] %v500_v53 }
 0x285   :  { %v504_v55 = vpop.f32.mrf.mxu0 }
 0x286   :  { %v505_v56 = vadd.f32 %v571_v38, %v504_v55 }
 0x287   :  { %v725_v57 = vpop.f32.mrf.mxu0 }
 0x288   :  { %540 = vst [vmem:[%s1005_s3 + $0x30] sm:$0xff] %v505_v56 }
 0x289   :  { %v507_v58 = vpop.f32.mrf.mxu0 }
 0x28a   :  { %v508_v59 = vadd.f32 %v571_v38, %v507_v58 }
 0x28b   :  { %v726_v60 = vpop.f32.mrf.mxu0 }
 0x28c   :  { %541 = vst [vmem:[%s1005_s3 + $0x38] sm:$0xff] %v508_v59 }
 0x28d   :  { %v512_v61 = vpop.f32.mrf.mxu0 }
 0x28e   :  { %v513_v62 = vadd.f32 %v571_v38, %v512_v61 }
 0x28f   :  { %v729_v63 = vpop.f32.mrf.mxu0 }
 0x290   :  { %542 = vst [vmem:[%s1005_s3 + $0x40] sm:$0xff] %v513_v62 }
 0x291   :  { %v515_v1 = vpop.f32.mrf.mxu0 }
 0x292   :  { %v516_v2 = vadd.f32 %v571_v38, %v515_v1 }
 0x293   :  { %v730_v3 = vpop.f32.mrf.mxu0 }
 0x294   :  { %543 = vst [vmem:[%s1005_s3 + $0x48] sm:$0xff] %v516_v2 }
 0x295   :  { %v520_v4 = vpop.f32.mrf.mxu0 }
 0x296   :  { %v521_v5 = vadd.f32 %v571_v38, %v520_v4 }
 0x297   :  { %v733_v6 = vpop.f32.mrf.mxu0 }
 0x298   :  { %544 = vst [vmem:[%s1005_s3 + $0x50] sm:$0xff] %v521_v5 }
 0x299   :  { %v523_v7 = vpop.f32.mrf.mxu0 }
 0x29a   :  { %v524_v8 = vadd.f32 %v571_v38, %v523_v7 }
 0x29b   :  { %v734_v9 = vpop.f32.mrf.mxu0 }
 0x29c   :  { %545 = vst [vmem:[%s1005_s3 + $0x58] sm:$0xff] %v524_v8 }
 0x29d   :  { %v528_v10 = vpop.f32.mrf.mxu0 }
 0x29e   :  { %v529_v11 = vadd.f32 %v571_v38, %v528_v10 }
 0x29f   :  { %v737_v12 = vpop.f32.mrf.mxu0 }
 0x2a0   :  { %546 = vst [vmem:[%s1005_s3 + $0x60] sm:$0xff] %v529_v11 }
 0x2a1   :  { %v531_v13 = vpop.f32.mrf.mxu0 }
 0x2a3   :  { %v738_v14 = vpop.f32.mrf.mxu0 }
 0x2a4   :  { %551 = vsyncpa [#allocation3], 1 }

</bundles_post_ra>
